<compile_context>
chip_gen: v5e
topology: v5e:2x2
jax: 0.10.0
libtpu: 0.0.40
codegen_flags: <defaults>
</compile_context>

<pallas_src>
import jax
import jax.numpy as jnp
from jax.experimental import pallas as pl
from jax.experimental.pallas import tpu as pltpu

_VMEM_LIMIT_BYTES = 32 * 1024 * 1024        # explicit scoped-VMEM request (safe on v5e/v6e/v7x)
_VMEM_BUDGET_BYTES = 24 * 1024 * 1024       # working-set budget used to size TILE_N
_ONEHOT_TABLE_LIMIT_BYTES = 8 * 1024 * 1024  # above this, use the HBM DMA-gather path


def _round_up(x, m):
    return ((x + m - 1) // m) * m


def _pick_tile_n(n, feature_num, latent_dim, itemsize):
    """Largest TILE_N whose per-grid-step working set fits the VMEM budget."""
    # Table counted twice: covers default double buffering without relying on
    # pl.Buffered(1) support (v7x-tight case is handled by the gather path).
    table_bytes = 2 * feature_num * latent_dim * itemsize
    lane_f = max(feature_num, 128)                      # one-hot lane padding
    cap = max(8, min(512, _round_up(n, 8)))             # no point exceeding the problem size
    for cand in (512, 256, 128, 64, 32, 16, 8):
        if cand > cap:
            continue
        step_bytes = (table_bytes
                      + 2 * cand * latent_dim * itemsize   # output tile, x2 buffers
                      + 2 * cand * 4                       # index column, x2 buffers
                      + cand * lane_f * 4)                 # one-hot operand (f32)
        if step_bytes <= _VMEM_BUDGET_BYTES:
            return cand
    return 8


def _onehot_embedding_kernel(idx_ref, emb_ref, out_ref):
    """Gather TILE_N embedding rows via a one-hot MXU matmul.

    idx_ref : (TILE_N, 1) int32              -- this step's indices only
    emb_ref : (feature_num, latent_dim) f32  -- full table, resident in VMEM
    out_ref : (TILE_N, latent_dim)
    """
    tile_n = out_ref.shape[0]
    feature_num = emb_ref.shape[0]

    idx = idx_ref[...]                                             # (TILE_N, 1)
    # Lane-dense one-hot: feature_num on the lane axis, TILE_N on sublanes.
    iota_f = jax.lax.broadcasted_iota(jnp.int32, (tile_n, feature_num), 1)
    onehot = (idx == iota_f).astype(emb_ref.dtype)                 # (TILE_N, feature_num)

    # Natural (M, K) x (K, N) contraction -- straight MXU matmul, no transposes.
    # NOTE: keeping f32 for bit-exactness vs the reference; a bf16 table would
    # halve VMEM and run the MXU at native bf16 rate if downstream tolerates it.
    out = jnp.dot(onehot, emb_ref[...], preferred_element_type=jnp.float32)
    out_ref[...] = out.astype(out_ref.dtype)


def _row_gather_kernel(idx_ref, emb_row_ref, out_ref):
    """DMA-gather path body: the BlockSpec already fetched the right row."""
    del idx_ref  # only used by the index_maps (scalar prefetch, lives in SMEM)
    out_ref[...] = emb_row_ref[...]


def _embedding_onehot_matmul(flat_idx, embedding):
    n = flat_idx.shape[0]
    feature_num, latent_dim = embedding.shape
    tile_n = _pick_tile_n(n, feature_num, latent_dim, embedding.dtype.itemsize)

    n_pad = _round_up(n, tile_n)
    num_tiles = n_pad // tile_n
    if n_pad != n:
        flat_idx = jnp.pad(flat_idx, (0, n_pad - n))   # padded rows gather row 0; sliced off
    idx_col = flat_idx.reshape(n_pad, 1)

    out = pl.pallas_call(
        _onehot_embedding_kernel,
        out_shape=jax.ShapeDtypeStruct((n_pad, latent_dim), embedding.dtype),
        grid=(num_tiles,),
        in_specs=[
            # Each step only sees its own (TILE_N, 1) index column.
            pl.BlockSpec((tile_n, 1), lambda i: (i, 0)),
            # Full table resident across the grid (constant index_map -> fetched once).
            pl.BlockSpec((feature_num, latent_dim), lambda i: (0, 0)),
        ],
        out_specs=pl.BlockSpec((tile_n, latent_dim), lambda i: (i, 0)),
        compiler_params=pltpu.CompilerParams(
            dimension_semantics=("parallel",),          # independent tiles -> 2 TCs on v7x
            vmem_limit_bytes=_VMEM_LIMIT_BYTES,
        ),
    )(idx_col, embedding)
    return out[:n]


def _embedding_dma_gather(flat_idx, embedding):
    """Large-vocab path: table stays in HBM, rows DMA'd via scalar-prefetch index_map."""
    flat_idx = flat_idx.reshape(-1).astype(jnp.int32)
    n = flat_idx.shape[0]
    feature_num, latent_dim = embedding.shape

    return pl.pallas_call(
        _row_gather_kernel,
        out_shape=jax.ShapeDtypeStruct((n, latent_dim), embedding.dtype),
        grid_spec=pltpu.PrefetchScalarGridSpec(
            num_scalar_prefetch=1,
            grid=(n,),
            in_specs=[
                # Row gather: block index along dim 0 comes from the prefetched indices.
                pl.BlockSpec((1, latent_dim), lambda i, idx: (idx[i], 0)),
            ],
            out_specs=pl.BlockSpec((1, latent_dim), lambda i, idx: (i, 0)),
        ),
        compiler_params=pltpu.CompilerParams(
            dimension_semantics=("parallel",),
            vmem_limit_bytes=_VMEM_LIMIT_BYTES,
        ),
    )(flat_idx, embedding)
    # TODO(synk): batch several gathered rows per grid step with manual
    # make_async_copy double-buffering to amortize the ~0.35us per-step overhead.


@jax.jit
def feature_embedding(x, embedding):
    """Pallas equivalent of FeatureEmbedding.forward.

    x:         (batch_size, num_fields) integer indices
    embedding: (feature_num, latent_dim) float32
    returns:   (batch_size, num_fields, latent_dim) float32
    """
    batch_size, num_fields = x.shape
    feature_num, latent_dim = embedding.shape
    flat_idx = x.reshape(-1).astype(jnp.int32)

    table_bytes = feature_num * latent_dim * embedding.dtype.itemsize
    if table_bytes <= _ONEHOT_TABLE_LIMIT_BYTES:
        out_flat = _embedding_onehot_matmul(flat_idx, embedding)
    else:
        out_flat = _embedding_dma_gather(flat_idx, embedding)

    # TODO(synk): for latent_dim < 128, emit a lane-dense (rows, num_fields*latent_dim)
    # output slab from the kernel and reshape here to avoid masked partial stores.
    return out_flat.reshape(batch_size, num_fields, latent_dim)


def make_embedding_param(feature_num, latent_dim, key):
    """Deterministic xavier_uniform_ equivalent for a (feature_num, latent_dim) table."""
    limit = (6.0 / (feature_num + latent_dim)) ** 0.5
    return jax.random.uniform(
        key, (feature_num, latent_dim), dtype=jnp.float32,
        minval=-limit, maxval=limit)


if __name__ == "__main__":
    key = jax.random.PRNGKey(0)
    k_emb, k1, k2, k3 = jax.random.split(key, 4)

    feature_num, latent_dim = 32, 128
    embedding = make_embedding_param(feature_num, latent_dim, k_emb)

    configs = [
        (2, 8, k1),    # single tile
        (3, 5, k2),    # n not a multiple of 8 -> exercises padding
        (16, 20, k3),  # multiple tiles, larger TILE_N
    ]
    for batch_size, num_fields, kk in configs:
        x = jax.random.randint(kk, (batch_size, num_fields), 0, feature_num,
                               dtype=jnp.int32)
        out = jax.block_until_ready(feature_embedding(x, embedding))
        ref = embedding[x]
        assert out.shape == (batch_size, num_fields, latent_dim)
        assert jnp.allclose(out, ref), f"onehot path mismatch at {(batch_size, num_fields)}"

    # Also exercise the large-vocab DMA-gather path (same semantics) at small shape.
    xg = jax.random.randint(k1, (4, 6), 0, feature_num, dtype=jnp.int32)
    out_g = jax.block_until_ready(_embedding_dma_gather(xg.reshape(-1), embedding))
    assert jnp.allclose(out_g.reshape(4, 6, latent_dim), embedding[xg]), "gather path mismatch"

    print("KERNEL_OK")
</pallas_src>

<mosaic_0001>
module attributes {stable_mosaic.version = 11 : i64} {
  func.func @_onehot_embedding_kernel(%arg0: i32, %arg1: memref<16x1xi32, #tpu.memory_space<vmem>>, %arg2: memref<32x128xf32, #tpu.memory_space<vmem>>, %arg3: memref<16x128xf32, #tpu.memory_space<vmem>>) attributes {dimension_semantics = [#tpu.dimension_semantics<parallel>], iteration_bounds = array<i64: 1>, scalar_prefetch = 0 : i64, scratch_operands = 0 : i64, tpu.core_type = #tpu.core_type<tc>, window_params = [{transform_indices = @transform_0, window_bounds = array<i64: 16, 1>}, {pipeline_mode = #tpu.pipeline_mode<synchronous>, transform_indices = @transform_1, window_bounds = array<i64: 32, 128>}, {transform_indices = @transform_2, window_bounds = array<i64: 16, 128>}]} {
    %c0 = arith.constant 0 : index
    %c0_0 = arith.constant 0 : index
    %0 = vector.load %arg1[%c0, %c0_0] : memref<16x1xi32, #tpu.memory_space<vmem>>, vector<16x1xi32>
    %1 = tpu.iota {dimensions = array<i32: 1>} : vector<16x32xi32>
    %2 = vector.broadcast %0 : vector<16x1xi32> to vector<16x32xi32>
    %3 = arith.cmpi eq, %2, %1 : vector<16x32xi32>
    %4 = arith.extui %3 : vector<16x32xi1> to vector<16x32xi32>
    %5 = arith.sitofp %4 : vector<16x32xi32> to vector<16x32xf32>
    %c0_1 = arith.constant 0 : index
    %c0_2 = arith.constant 0 : index
    %6 = vector.load %arg2[%c0_1, %c0_2] : memref<32x128xf32, #tpu.memory_space<vmem>>, vector<32x128xf32>
    %cst = arith.constant dense<0.000000e+00> : vector<16x128xf32>
    %7 = tpu.matmul %5, %6, %cst {dimension_numbers = #tpu.dot_dimension_numbers<[1], [0], [0], [1], [0, 0, 1, 1], [], []>} : vector<16x32xf32>, vector<32x128xf32>, vector<16x128xf32> -> vector<16x128xf32>
    %c0_3 = arith.constant 0 : index
    %c0_4 = arith.constant 0 : index
    %8 = vector.load %arg3[%c0_3, %c0_4] : memref<16x128xf32, #tpu.memory_space<vmem>>, vector<16x128xf32>
    tpu.vector_store %arg3[%c0_3, %c0_4], %7 {strides = array<i32>} : memref<16x128xf32, #tpu.memory_space<vmem>>, vector<16x128xf32>,
    return
  }
  func.func @transform_0(%arg0: i32) -> (i32, i32) {
    %c0_i32 = arith.constant 0 : i32
    %c0_i32_0 = arith.constant 0 : i32
    return %arg0, %c0_i32 : i32, i32
  }
  func.func @transform_1(%arg0: i32) -> (i32, i32) {
    %c0_i32 = arith.constant 0 : i32
    %c0_i32_0 = arith.constant 0 : i32
    %c0_i32_1 = arith.constant 0 : i32
    return %c0_i32, %c0_i32_0 : i32, i32
  }
  func.func @transform_2(%arg0: i32) -> (i32, i32) {
    %c0_i32 = arith.constant 0 : i32
    %c0_i32_0 = arith.constant 0 : i32
    return %arg0, %c0_i32 : i32, i32
  }
}

</mosaic_0001>

<bundles_post_ra>
// kernel: feature_embedding.1
= control target key start
LH: loop header
LB: loop body
LE: loop exit
PB: predicated region body
PF: predicated region fallthrough
CT: control target
= control target key end

     0   :  { %7 = vsyncpa [#allocation3], 0  ;;  %s205_s0 = inlined_call_operand.vmem [shape: s32[16,1], index: 0, kind: input, shape index: {}]   ;;  %s206_s1 = inlined_call_operand.hbm [shape: f32[32,128], index: 1, kind: input, shape index: {}]   ;;  %s207_s2 = inlined_call_operand.hbm [shape: f32[16,128], index: 2, kind: output, shape index: {}]  }
   0x1   :  { %8 = vsyncpa [#allocation4], 0  ;;  %s15_s11 = sshll.u32 %s206_s1, 4  ;;  %s166_s12 = smov [#allocation2]   ;;  %s16_s11 = int_to_ptr.hbm [resolvable:$true] %s15_s11 }
   0x2   :  { %s17_s13 = sshll.u32 %s166_s12, 4  ;;  %s167_s14 = smov 128   ;;  %s18_s13 = int_to_ptr.vmem [resolvable:$true] %s17_s13 }
   0x3   :  { %s168_s15 = smov 8  }
   0x4   :  { %23 = dma.hbm_to_vmem [thread:$0]  %s16_s11, 512, %s18_s13, [#allocation3], %s167_s14, %s167_s14, %s168_s15  }
   0x5   :  { %162 = dma.done.wait [#allocation3], 512  }
   0x6   :  { %163 = vsyncadd [#allocation3], 4294966784  ;;  %v169_v0 = vmov 0   ;;  %v28_v1 = vld [vmem:[%s205_s0] sm:$0xff]  ;;  %v47_v2 = vld [vmem:[#allocation2 + $0x18] sm:$0xff]  ;;  %v30_v7 = vlaneseq  ;;  %vm48_vm0 = vcmask 261120  }
   0x7   :  { %113 = vset.pattern.permute.xlu0 %v169_v0  ;;  %67 = vmatpush.msra.mxu0 %v47_v2  ;;  %v46_v3 = vld [vmem:[#allocation2 + $0x10] sm:$0xff]  ;;  %v45_v4 = vld [vmem:[#allocation2 + $0x8] sm:$0xff]  ;;  %v44_v6 = vld [vmem:[#allocation2] sm:$0xff]  ;;  %v170_v10 = vmov 0.0   ;;  %s86_s22 = sshll.u32 %s207_s2, 4  ;;  %s87_s22 = int_to_ptr.hbm [resolvable:$true] %s86_s22 }
   0x8   :  { %33 = vperm.xlu0 %113, %v28_v1   ;;  %103 = vmatpush.msra.mxu1 %v47_v2  ;;  %v29_v5 = vld [vmem:[%s205_s0 + $0x8] sm:$0xff]  ;;  %v31_v8 = vand.u32 127, %v30_v7  ;;  %s171_s0 = smov [#allocation5]  }
   0x9   :  { %68 = vmatpush.msra.mxu0 %v46_v3  ;;  %s84_s19 = sshll.u32 %s171_s0, 4  ;;  %s85_s19 = int_to_ptr.vmem [resolvable:$true] %s84_s19 }
   0xa   :  { %104 = vmatpush.msra.mxu1 %v46_v3 }
   0xb   :  { %69 = vmatpush.msra.mxu0 %v45_v4 }
   0xc   :  { %105 = vmatpush.msra.mxu1 %v45_v4 }
   0xd   :  { %70 = vmatpush.msra.mxu0 %v44_v6 }
   0xe   :  { %106 = vmatpush.msra.mxu1 %v44_v6 }
  0x10   :  { %36 = vperm.xlu0 %113, %v29_v5  }
  0x7a   :  { %v34_v9 = vpop.permute.xlu0 %33 }
  0x7b   :  { %vm38_vm1 = vcmp.eq.s32.totalorder %v34_v9, %v31_v8 }
  0x7c   :  { %v99_v11 = vsel %vm38_vm1, 1.0, %v170_v10 }
  0x7d   :  { %101 = vmatmul.msk.f32.vlgmr.msra.gmra.mxu0 %vm48_vm0, %v99_v11 }
  0x82   :  { %v37_v12 = vpop.permute.xlu0 %36 }
  0x83   :  { %vm39_vm2 = vcmp.eq.s32.totalorder %v37_v12, %v31_v8 }
  0x84   :  { %v100_v13 = vsel %vm39_vm2, 1.0, %v170_v10 }
  0x85   :  { %102 = vmatmul.msk.f32.vlgmr.msra.gmra.mxu1 %vm48_vm0, %v100_v13 }
  0xfa   :  { %v72_v14 = vpop.f32.mrf.mxu0 }
  0xfb   :  { %78 = vst [vmem:[#allocation5] sm:$0xff] %v72_v14 }
 0x102   :  { %v75_v15 = vpop.f32.mrf.mxu1 }
 0x103   :  { %79 = vst [vmem:[#allocation5 + $0x8] sm:$0xff] %v75_v15 }
 0x104   :  { %92 = dma.vmem_to_hbm [thread:$0]  %s85_s19, 256, %s87_s22, [#allocation4], %s167_s14, %s167_s14, %s168_s15  }
 0x105   :  { %164 = dma.done.wait [#allocation4], 256  }
 0x106   :  { %165 = vsyncadd [#allocation4], 4294967040 }
 0x107   :  { %97 = vsyncpa [#allocation3], 1 }
 0x108   :  { %98 = vsyncpa [#allocation4], 1 }

</bundles_post_ra>
